<compile_context>
chip_gen: v7x
topology: tpu7x:2x2x1
jax: 0.10.0
libtpu: 0.0.40
codegen_flags: <defaults>
</compile_context>

<pallas_src>
import functools

import jax
import jax.numpy as jnp
from jax.experimental import pallas as pl
from jax.experimental.pallas import tpu as pltpu


def _attn_head_kernel(head_dim, scale,
                      x_ref, wqkv_ref, bqkv_ref, wo_ref, bo_ref,
                      out_ref, attn_ref, acc_ref):
    """One grid step = (one batch element, one attention head)."""
    h = pl.program_id(1)

    @pl.when(h == 0)
    def _():
        acc_ref[...] = jnp.zeros_like(acc_ref)

    x = x_ref[0]                                   # (S, E), input dtype
    dt = x.dtype

    # Fused per-head q/k/v projection: (S, E) @ (E, 3D) -> (S, 3D), f32 acc.
    qkv = jnp.dot(x, wqkv_ref[0], preferred_element_type=jnp.float32)
    qkv = qkv + bqkv_ref[0]                        # (1, 3D) broadcasts over S
    q = qkv[:, :head_dim].astype(dt)               # (S, D)
    k = qkv[:, head_dim:2 * head_dim].astype(dt)   # (S, D)
    v = qkv[:, 2 * head_dim:].astype(dt)           # (S, D)

    # Scores: contract over head_dim without materializing k.T.
    s = jax.lax.dot_general(q, k, (((1,), (1,)), ((), ())),
                            preferred_element_type=jnp.float32) * scale
    # Numerically-stable softmax; divide via EUP reciprocal.
    s = s - jnp.max(s, axis=-1, keepdims=True)
    e = jnp.exp(s)
    p = e * pl.reciprocal(jnp.sum(e, axis=-1, keepdims=True), approx=True)

    attn_ref[0, 0] = p.astype(attn_ref.dtype)      # (S, S) probs for this head

    # Context and this head's contribution to the output projection:
    #   out = sum_h (p_h @ v_h) @ WoT[h*D:(h+1)*D, :] + bo
    ctx = jnp.dot(p.astype(dt), v, preferred_element_type=jnp.float32)   # (S, D)
    acc_ref[...] += jnp.dot(ctx.astype(dt), wo_ref[0],
                            preferred_element_type=jnp.float32)          # (S, E)

    @pl.when(h == pl.num_programs(1) - 1)
    def _():
        out_ref[0] = (acc_ref[...] + bo_ref[0]).astype(out_ref.dtype)


def _vmem_limit_bytes(S, E, D):
    f32 = 4
    per_step = (S * E + E * 3 * D + 3 * D + D * E + E + S * E + S * S) * f32
    need = 2 * per_step + S * E * f32          # double-buffered blocks + accumulator
    return int(min(max(2 * need, 32 * 1024 * 1024), 64 * 1024 * 1024))


def self_attention(hidden_states, params, *, num_heads):
    """hidden_states: (B, S, E).  params: torch-convention W:(out,in), b:(1,out)."""
    B, S, E = hidden_states.shape
    D = E // num_heads
    scale = D ** (-0.5)

    # ---- host-side (one-time) weight repacking: pre-transpose + fuse QKV ----
    def per_head_cols(w):                      # (E, E) torch layout -> (H, E, D)
        return jnp.transpose(w.T.reshape(E, num_heads, D), (1, 0, 2))

    w_qkv = jnp.concatenate(
        [per_head_cols(params["wq"]),
         per_head_cols(params["wk"]),
         per_head_cols(params["wv"])], axis=-1)                 # (H, E, 3D)
    b_qkv = jnp.concatenate(
        [params["bq"].reshape(num_heads, 1, D),
         params["bk"].reshape(num_heads, 1, D),
         params["bv"].reshape(num_heads, 1, D)], axis=-1)       # (H, 1, 3D)
    wo_h = params["wo"].T.reshape(num_heads, D, E)              # (H, D, E)
    bo = params["bo"]                                           # (1, E)

    kernel = functools.partial(_attn_head_kernel, D, scale)

    itemsize = jnp.dtype(hidden_states.dtype).itemsize
    cost = pl.CostEstimate(
        flops=2 * B * num_heads * (S * E * 3 * D + 2 * S * S * D + S * D * E),
        transcendentals=B * num_heads * S * S,
        bytes_accessed=(B * num_heads * S * E * itemsize        # x re-read per head
                        + (num_heads * E * 4 * D) * itemsize    # fused weights
                        + B * S * E * itemsize                  # output
                        + B * num_heads * S * S * 4),           # attn weights
    )

    out, attn = pl.pallas_call(
        kernel,
        out_shape=(
            jax.ShapeDtypeStruct((B, S, E), hidden_states.dtype),
            jax.ShapeDtypeStruct((B, num_heads, S, S), jnp.float32),
        ),
        grid_spec=pltpu.PrefetchScalarGridSpec(
            num_scalar_prefetch=0,
            grid=(B, num_heads),
            in_specs=[
                pl.BlockSpec((1, S, E), lambda b, h: (b, 0, 0)),      # x
                pl.BlockSpec((1, E, 3 * D), lambda b, h: (h, 0, 0)),  # fused qkv W
                pl.BlockSpec((1, 1, 3 * D), lambda b, h: (h, 0, 0)),  # fused qkv b
                pl.BlockSpec((1, D, E), lambda b, h: (h, 0, 0)),      # out-proj rows
                pl.BlockSpec((1, E), lambda b, h: (0, 0)),            # out-proj bias
            ],
            out_specs=[
                pl.BlockSpec((1, S, E), lambda b, h: (b, 0, 0)),      # accumulated out
                pl.BlockSpec((1, 1, S, S), lambda b, h: (b, h, 0, 0)),  # per-head probs
            ],
            scratch_shapes=[pltpu.VMEM((S, E), jnp.float32)],
        ),
        compiler_params=pltpu.CompilerParams(
            dimension_semantics=("parallel", "arbitrary"),
            vmem_limit_bytes=_vmem_limit_bytes(S, E, D),
        ),
        cost_estimate=cost,
    )(hidden_states, w_qkv, b_qkv, wo_h, bo)
    return out, attn


def _reference(hidden_states, params, *, num_heads):
    """Plain-JAX reference mirroring the PyTorch forward exactly."""
    B, S, E = hidden_states.shape
    D = E // num_heads
    scale = D ** (-0.5)

    def lin(x, w, b):
        return x @ w.T + b[0]

    q = lin(hidden_states, params["wq"], params["bq"])
    k = lin(hidden_states, params["wk"], params["bk"])
    v = lin(hidden_states, params["wv"], params["bv"])
    q = q.reshape(B, S, num_heads, D).transpose(0, 2, 1, 3)
    k = k.reshape(B, S, num_heads, D).transpose(0, 2, 1, 3)
    v = v.reshape(B, S, num_heads, D).transpose(0, 2, 1, 3)
    attn = jax.nn.softmax(q @ k.transpose(0, 1, 3, 2) * scale, axis=-1)
    out = (attn @ v).transpose(0, 2, 1, 3).reshape(B, S, E)
    out = lin(out, params["wo"], params["bo"])
    return out, attn


if __name__ == "__main__":
    # Small config consistent with the module: hidden_size=32, num_heads=4.
    B, S, E, H = 2, 8, 32, 4

    key = jax.random.PRNGKey(0)
    ks = jax.random.split(key, 9)
    init = lambda k, shape: (jax.random.normal(k, shape, jnp.float32) * 0.05)
    params = {
        "wq": init(ks[0], (E, E)), "bq": init(ks[1], (1, E)),
        "wk": init(ks[2], (E, E)), "bk": init(ks[3], (1, E)),
        "wv": init(ks[4], (E, E)), "bv": init(ks[5], (1, E)),
        "wo": init(ks[6], (E, E)), "bo": init(ks[7], (1, E)),
    }
    x = jax.random.normal(ks[8], (B, S, E), jnp.float32)

    out, attn = self_attention(x, params, num_heads=H)
    out = jax.block_until_ready(out)
    attn = jax.block_until_ready(attn)

    ref_out, ref_attn = _reference(x, params, num_heads=H)
    # Tolerance loosened slightly because the softmax denominator uses the
    # EUP approximate reciprocal (pl.reciprocal(approx=True)).
    assert jnp.allclose(out, ref_out, atol=1e-3, rtol=1e-3)
    assert jnp.allclose(attn, ref_attn, atol=1e-3, rtol=1e-3)

    print("KERNEL_OK")
</pallas_src>

<mosaic_0001>
module attributes {stable_mosaic.version = 11 : i64} {
  func.func @_attn_head_kernel(%arg0: i32, %arg1: i32, %arg2: memref<1x8x32xf32, #tpu.memory_space<vmem>>, %arg3: memref<1x32x24xf32, #tpu.memory_space<vmem>>, %arg4: memref<1x1x24xf32, #tpu.memory_space<vmem>>, %arg5: memref<1x8x32xf32, #tpu.memory_space<vmem>>, %arg6: memref<1x32xf32, #tpu.memory_space<vmem>>, %arg7: memref<1x8x32xf32, #tpu.memory_space<vmem>>, %arg8: memref<1x1x8x8xf32, #tpu.memory_space<vmem>>, %arg9: memref<8x32xf32, #tpu.memory_space<vmem>>) attributes {dimension_semantics = [#tpu.dimension_semantics<parallel>, #tpu.dimension_semantics<arbitrary>], iteration_bounds = array<i64: 2, 4>, scalar_prefetch = 0 : i64, scratch_operands = 1 : i64, tpu.core_type = #tpu.core_type<tc>, window_params = [{transform_indices = @transform_0, window_bounds = array<i64: 1, 8, 32>}, {transform_indices = @transform_1, window_bounds = array<i64: 1, 32, 24>}, {transform_indices = @transform_2, window_bounds = array<i64: 1, 1, 24>}, {transform_indices = @transform_3, window_bounds = array<i64: 1, 8, 32>}, {pipeline_mode = #tpu.pipeline_mode<synchronous>, transform_indices = @transform_4, window_bounds = array<i64: 1, 32>}, {transform_indices = @transform_5, window_bounds = array<i64: 1, 8, 32>}, {transform_indices = @transform_6, window_bounds = array<i64: 1, 1, 8, 8>}]} {
    %c0_i32 = arith.constant 0 : i32
    %0 = arith.cmpi eq, %arg1, %c0_i32 : i32
    %1 = arith.extui %0 : i1 to i32
    %c0_i32_0 = arith.constant 0 : i32
    %2 = arith.cmpi ne, %1, %c0_i32_0 : i32
    scf.if %2 {
      %cst_27 = arith.constant 0.000000e+00 : f32
      %41 = vector.broadcast %cst_27 : f32 to vector<8x32xf32>
      %c0_28 = arith.constant 0 : index
      %c0_29 = arith.constant 0 : index
      %42 = vector.load %arg9[%c0_28, %c0_29] : memref<8x32xf32, #tpu.memory_space<vmem>>, vector<8x32xf32>
      tpu.vector_store %arg9[%c0_28, %c0_29], %41 {strides = array<i32>} : memref<8x32xf32, #tpu.memory_space<vmem>>, vector<8x32xf32>,
    } else {
    }
    %c0 = arith.constant 0 : index
    %c0_1 = arith.constant 0 : index
    %c0_2 = arith.constant 0 : index
    %3 = vector.load %arg2[%c0, %c0_1, %c0_2] : memref<1x8x32xf32, #tpu.memory_space<vmem>>, vector<1x8x32xf32>
    %4 = vector.shape_cast %3 : vector<1x8x32xf32> to vector<8x32xf32>
    %c0_3 = arith.constant 0 : index
    %c0_4 = arith.constant 0 : index
    %c0_5 = arith.constant 0 : index
    %5 = vector.load %arg3[%c0_3, %c0_4, %c0_5] : memref<1x32x24xf32, #tpu.memory_space<vmem>>, vector<1x32x24xf32>
    %6 = vector.shape_cast %5 : vector<1x32x24xf32> to vector<32x24xf32>
    %cst = arith.constant dense<0.000000e+00> : vector<8x24xf32>
    %7 = tpu.matmul %4, %6, %cst {dimension_numbers = #tpu.dot_dimension_numbers<[1], [0], [0], [1], [0, 0, 1, 1], [], []>} : vector<8x32xf32>, vector<32x24xf32>, vector<8x24xf32> -> vector<8x24xf32>
    %c0_6 = arith.constant 0 : index
    %c0_7 = arith.constant 0 : index
    %c0_8 = arith.constant 0 : index
    %8 = vector.load %arg4[%c0_6, %c0_7, %c0_8] : memref<1x1x24xf32, #tpu.memory_space<vmem>>, vector<1x1x24xf32>
    %9 = vector.shape_cast %8 : vector<1x1x24xf32> to vector<1x24xf32>
    %10 = vector.broadcast %9 : vector<1x24xf32> to vector<8x24xf32>
    %11 = arith.addf %7, %10 : vector<8x24xf32>
    %12 = vector.extract_strided_slice %11 {offsets = [0, 0], sizes = [8, 8], strides = [1, 1]} : vector<8x24xf32> to vector<8x8xf32>
    %13 = vector.extract_strided_slice %11 {offsets = [0, 8], sizes = [8, 8], strides = [1, 1]} : vector<8x24xf32> to vector<8x8xf32>
    %14 = vector.extract_strided_slice %11 {offsets = [0, 16], sizes = [8, 8], strides = [1, 1]} : vector<8x24xf32> to vector<8x8xf32>
    %cst_9 = arith.constant dense<0.000000e+00> : vector<8x8xf32>
    %15 = tpu.matmul %12, %13, %cst_9 {dimension_numbers = #tpu.dot_dimension_numbers<[1], [1], [0], [0], [0, 0, 1, 0], [], []>} : vector<8x8xf32>, vector<8x8xf32>, vector<8x8xf32> -> vector<8x8xf32>
    %cst_10 = arith.constant 0.353553385 : f32
    %16 = vector.broadcast %cst_10 : f32 to vector<8x8xf32>
    %17 = arith.mulf %15, %16 : vector<8x8xf32>
    %cst_11 = arith.constant dense<0xFF800000> : vector<8xf32>
    %18 = vector.multi_reduction <maximumf>, %17, %cst_11 [1] : vector<8x8xf32> to vector<8xf32>
    %19 = vector.shape_cast %18 : vector<8xf32> to vector<8x1xf32>
    %20 = vector.broadcast %19 : vector<8x1xf32> to vector<8x8xf32>
    %21 = arith.subf %17, %20 : vector<8x8xf32>
    %22 = math.exp %21 : vector<8x8xf32>
    %cst_12 = arith.constant dense<0.000000e+00> : vector<8xf32>
    %23 = vector.multi_reduction <add>, %22, %cst_12 [1] : vector<8x8xf32> to vector<8xf32>
    %24 = vector.shape_cast %23 : vector<8xf32> to vector<8x1xf32>
    %25 = tpu.reciprocal %24 {approx = true} : vector<8x1xf32> -> vector<8x1xf32>
    %26 = vector.broadcast %25 : vector<8x1xf32> to vector<8x8xf32>
    %27 = arith.mulf %22, %26 : vector<8x8xf32>
    %c0_13 = arith.constant 0 : index
    %c0_14 = arith.constant 0 : index
    %c0_15 = arith.constant 0 : index
    %c0_16 = arith.constant 0 : index
    %28 = vector.load %arg8[%c0_13, %c0_14, %c0_15, %c0_16] : memref<1x1x8x8xf32, #tpu.memory_space<vmem>>, vector<1x1x8x8xf32>
    %29 = vector.shape_cast %28 : vector<1x1x8x8xf32> to vector<8x8xf32>
    %30 = vector.shape_cast %27 : vector<8x8xf32> to vector<1x1x8x8xf32>
    tpu.vector_store %arg8[%c0_13, %c0_14, %c0_15, %c0_16], %30 {strides = array<i32>} : memref<1x1x8x8xf32, #tpu.memory_space<vmem>>, vector<1x1x8x8xf32>,
    %cst_17 = arith.constant dense<0.000000e+00> : vector<8x8xf32>
    %31 = tpu.matmul %27, %14, %cst_17 {dimension_numbers = #tpu.dot_dimension_numbers<[1], [0], [0], [1], [0, 0, 1, 1], [], []>} : vector<8x8xf32>, vector<8x8xf32>, vector<8x8xf32> -> vector<8x8xf32>
    %c0_18 = arith.constant 0 : index
    %c0_19 = arith.constant 0 : index
    %32 = vector.load %arg9[%c0_18, %c0_19] : memref<8x32xf32, #tpu.memory_space<vmem>>, vector<8x32xf32>
    %c0_20 = arith.constant 0 : index
    %c0_21 = arith.constant 0 : index
    %c0_22 = arith.constant 0 : index
    %33 = vector.load %arg5[%c0_20, %c0_21, %c0_22] : memref<1x8x32xf32, #tpu.memory_space<vmem>>, vector<1x8x32xf32>
    %34 = vector.shape_cast %33 : vector<1x8x32xf32> to vector<8x32xf32>
    %cst_23 = arith.constant dense<0.000000e+00> : vector<8x32xf32>
    %35 = tpu.matmul %31, %34, %cst_23 {dimension_numbers = #tpu.dot_dimension_numbers<[1], [0], [0], [1], [0, 0, 1, 1], [], []>} : vector<8x8xf32>, vector<8x32xf32>, vector<8x32xf32> -> vector<8x32xf32>
    %36 = arith.addf %32, %35 : vector<8x32xf32>
    %c0_24 = arith.constant 0 : index
    %c0_25 = arith.constant 0 : index
    %37 = vector.load %arg9[%c0_24, %c0_25] : memref<8x32xf32, #tpu.memory_space<vmem>>, vector<8x32xf32>
    tpu.vector_store %arg9[%c0_24, %c0_25], %36 {strides = array<i32>} : memref<8x32xf32, #tpu.memory_space<vmem>>, vector<8x32xf32>,
    %c3_i32 = arith.constant 3 : i32
    %38 = arith.cmpi eq, %arg1, %c3_i32 : i32
    %39 = arith.extui %38 : i1 to i32
    %c0_i32_26 = arith.constant 0 : i32
    %40 = arith.cmpi ne, %39, %c0_i32_26 : i32
    scf.if %40 {
      %c0_27 = arith.constant 0 : index
      %c0_28 = arith.constant 0 : index
      %41 = vector.load %arg9[%c0_27, %c0_28] : memref<8x32xf32, #tpu.memory_space<vmem>>, vector<8x32xf32>
      %c0_29 = arith.constant 0 : index
      %c0_30 = arith.constant 0 : index
      %42 = vector.load %arg6[%c0_29, %c0_30] : memref<1x32xf32, #tpu.memory_space<vmem>>, vector<1x32xf32>
      %43 = vector.shape_cast %42 : vector<1x32xf32> to vector<32xf32>
      %44 = vector.shape_cast %43 : vector<32xf32> to vector<1x32xf32>
      %45 = vector.broadcast %44 : vector<1x32xf32> to vector<8x32xf32>
      %46 = arith.addf %41, %45 : vector<8x32xf32>
      %c0_31 = arith.constant 0 : index
      %c0_32 = arith.constant 0 : index
      %c0_33 = arith.constant 0 : index
      %47 = vector.load %arg7[%c0_31, %c0_32, %c0_33] : memref<1x8x32xf32, #tpu.memory_space<vmem>>, vector<1x8x32xf32>
      %48 = vector.shape_cast %47 : vector<1x8x32xf32> to vector<8x32xf32>
      %49 = vector.shape_cast %46 : vector<8x32xf32> to vector<1x8x32xf32>
      tpu.vector_store %arg7[%c0_31, %c0_32, %c0_33], %49 {strides = array<i32>} : memref<1x8x32xf32, #tpu.memory_space<vmem>>, vector<1x8x32xf32>,
    } else {
    }
    return
  }
  func.func @transform_0(%arg0: i32, %arg1: i32) -> (i32, i32, i32) {
    %c0_i32 = arith.constant 0 : i32
    %c0_i32_0 = arith.constant 0 : i32
    %c0_i32_1 = arith.constant 0 : i32
    return %arg0, %c0_i32, %c0_i32_0 : i32, i32, i32
  }
  func.func @transform_1(%arg0: i32, %arg1: i32) -> (i32, i32, i32) {
    %c0_i32 = arith.constant 0 : i32
    %c0_i32_0 = arith.constant 0 : i32
    %c0_i32_1 = arith.constant 0 : i32
    return %arg1, %c0_i32, %c0_i32_0 : i32, i32, i32
  }
  func.func @transform_2(%arg0: i32, %arg1: i32) -> (i32, i32, i32) {
    %c0_i32 = arith.constant 0 : i32
    %c0_i32_0 = arith.constant 0 : i32
    %c0_i32_1 = arith.constant 0 : i32
    return %arg1, %c0_i32, %c0_i32_0 : i32, i32, i32
  }
  func.func @transform_3(%arg0: i32, %arg1: i32) -> (i32, i32, i32) {
    %c0_i32 = arith.constant 0 : i32
    %c0_i32_0 = arith.constant 0 : i32
    %c0_i32_1 = arith.constant 0 : i32
    return %arg1, %c0_i32, %c0_i32_0 : i32, i32, i32
  }
  func.func @transform_4(%arg0: i32, %arg1: i32) -> (i32, i32) {
    %c0_i32 = arith.constant 0 : i32
    %c0_i32_0 = arith.constant 0 : i32
    %c0_i32_1 = arith.constant 0 : i32
    return %c0_i32, %c0_i32_0 : i32, i32
  }
  func.func @transform_5(%arg0: i32, %arg1: i32) -> (i32, i32, i32) {
    %c0_i32 = arith.constant 0 : i32
    %c0_i32_0 = arith.constant 0 : i32
    %c0_i32_1 = arith.constant 0 : i32
    return %arg0, %c0_i32, %c0_i32_0 : i32, i32, i32
  }
  func.func @transform_6(%arg0: i32, %arg1: i32) -> (i32, i32, i32, i32) {
    %c0_i32 = arith.constant 0 : i32
    %c0_i32_0 = arith.constant 0 : i32
    %c0_i32_1 = arith.constant 0 : i32
    return %arg0, %arg1, %c0_i32, %c0_i32_0 : i32, i32, i32, i32
  }
}

</mosaic_0001>

<bundles_post_ra>
// kernel: tpu_custom_call.1
= control target key start
LH: loop header
LB: loop body
LE: loop exit
PB: predicated region body
PF: predicated region fallthrough
CT: control target
= control target key end

     0   :  { %s1496_s0 = inlined_call_operand.vmem [shape: f32[2,8,32], index: 0, kind: input, shape index: {}]   ;;  %s1497_s1 = inlined_call_operand.vmem [shape: f32[4,32,24], index: 1, kind: input, shape index: {}]   ;;  %s1498_s2 = inlined_call_operand.vmem [shape: f32[4,1,24], index: 2, kind: input, shape index: {}]   ;;  %s1499_s3 = inlined_call_operand.vmem [shape: f32[4,8,32], index: 3, kind: input, shape index: {}]   ;;  %s1500_s4 = inlined_call_operand.vmem [shape: f32[1,32], index: 4, kind: input, shape index: {}]   ;;  %s1501_s5 = inlined_call_operand.hbm [shape: f32[2,8,32], index: 5, kind: output, shape index: {0}]   ;;  %s1502_s6 = inlined_call_operand.hbm [shape: f32[2,4,8,8], index: 6, kind: output, shape index: {1}]  }
   0x1   :  { %1520 = sst [smem:[#allocation23_spill]] %s1502_s6 }
   0x2   :  { %12 = vsyncpa [#allocation4], 0 }
   0x3   :  { %14 = vsyncpa [#allocation4 + $0x1], 0 }
   0x4   :  { %15 = vsyncpa [#allocation6], 0 }
   0x5   :  { %17 = vsyncpa [#allocation6 + $0x1], 0  ;;  %s1220_s21 = smov 0   ;;  %s1222_s22 = smov 0  }
   0x6   :  { %s1224_s23 = smov 0   ;;  %s1226_s24 = smov 0  }
   0x7   :  { %s1228_s25 = smov 0   ;;  %s1230_s26 = smov 0  }
   0x8   :  { %s1232_s27 = smov 0   ;;  %s1234_s28 = smov 0  }
   0x9   :  { %s1236_s29 = smov 0   ;;  %s1238_s30 = smov 0  }
   0xa   :  { %s1240_s7 = smov 0  }
   0xb LB: > { %1521 = sst [smem:[#allocation9_spill]] %s1135_s21  ;;  %s844_s8 = sadd.s32 4294967295, %s1175_s7   ;;  %s1175_s7 = sphi %s1240_s7, %s23_s7   ;;  %s1171_s30 = sphi %s1238_s30, %s1558_s30   ;;  %s1167_s29 = sphi %s1236_s29, %s1563_s29   ;;  %s1163_s28 = sphi %s1234_s28, %s1556_s28   ;;  %s1159_s27 = sphi %s1232_s27, %s1555_s27   ;;  %s1155_s26 = sphi %s1230_s26, %s1554_s26   ;;  %s1151_s25 = sphi %s1228_s25, %s1562_s25   ;;  %s1147_s24 = sphi %s1226_s24, %s1561_s24   ;;  %s1143_s23 = sphi %s1224_s23, %s1552_s23   ;;  %s1139_s22 = sphi %s1222_s22, %s1560_s22   ;;  %s1135_s21 = sphi %s1220_s21, %s1559_s21  }
   0xc   : > { %1522 = sst [smem:[#allocation10_spill]] %s1143_s23  ;;  %s845_s9 = sadd.s32 4294967294, %s1175_s7  }
   0xd   : > { %1523 = sst [smem:[#allocation11_spill]] %s1147_s24  ;;  %s32_s10 = sadd.s32 1, %s1167_s29 }
   0xe   : > { %1524 = sst [smem:[#allocation12_spill]] %s1155_s26  ;;  %s35_s11 = sadd.s32 1, %s1171_s30 }
   0xf   : > { %1525 = sst [smem:[#allocation13_spill]] %s1167_s29  ;;  %p33_p0 = scmp.ge.s32.totalorder %s32_s10, 4 }
  0x10   : > { %1526 = sst [smem:[#allocation14_spill]] %s1171_s30  ;;  %s167_s12 = sadd.s32 1, %s1155_s26 }
  0x11   : > { %1527 = sst [smem:[#allocation15_spill]] %s1175_s7  ;;  %p177_p1 = scmp.ne.s32.totalorder %s1155_s26, %s1151_s25 }
  0x12   : > { %p1282_p2 = scmp.eq.s32.totalorder %s844_s8, 7  ;;  %s1565_s10 = smov (%p33_p0, %s32_s10), 0 }
  0x13   : > { %1529 = sst [smem:[#allocation16_spill]] %s1565_s10  ;;  %s1567_s11 = smov (!%p33_p0, %s35_s11), %s1171_s30 }
  0x14   : > { %p1291_p3 = por %p1282_p2, %p177_p1  ;;  %p183_p4 = scmp.ne.s32.totalorder %s1151_s25, %s1147_s24 }
  0x15   : > { %p37_p5 = scmp.ge.s32.totalorder %s1567_s11, 2  ;;  %p1297_p6 = scmp.eq.s32.totalorder %s845_s9, 7 }
  0x16   : > { %s191_s16 = ssub.s32 %s1167_s29, %s1565_s10  ;;  %s195_s17 = sadd.s32 1, %s1143_s23 }
  0x17   : > { %s1569_s11 = smov (%p37_p5, %s1567_s11), 0  ;;  %p1308_p7 = por %p1297_p6, %p183_p4 }
  0x18   : > { %1532 = sst [smem:[#allocation17_spill]] %s1569_s11  ;;  %p205_p8 = scmp.ne.s32.totalorder %s1143_s23, %s1139_s22 }
  0x19   : > { %s1533_s18 = scalar_select %p1308_p7, 1, 0 }
  0x1a   : > { %s164_s19 = ssub.s32 %s1171_s30, %s1569_s11  ;;  %p211_p9 = scmp.ne.s32.totalorder %s1139_s22, %s1135_s21 }
  0x1b   : > { %1534 = sst [smem:[#allocation18_spill]] %s1533_s18  ;;  %p165_p10 = scmp.eq.s32.totalorder %s164_s19, 0 }
  0x1c   : > { %s192_s20 = sor.u32 %s191_s16, %s164_s19  ;;  %p1320_p12 = por %p205_p8, %p1282_p2 }
  0x1d   : > { %p193_p11 = scmp.eq.s32.totalorder %s192_s20, 0  ;;  %p1332_p13 = por %p211_p9, %p1297_p6 }
  0x1e   : > { %s1535_s8 = scalar_select %p1320_p12, 1, 0 }
  0x1f   : > { %s1325_s9 = scalar_select %p165_p10, %s1155_s26, %s167_s12  }
  0x20   : > { %1536 = sst [smem:[#allocation19_spill]] %s1535_s8  ;;  %p848_p0 = scmp.ge.s32.totalorder %s1175_s7, 1 }
  0x21   : > { %1537 = sst [smem:[#allocation20_spill]] %s1325_s9  ;;  %p261_p1 = scmp.lt.s32.totalorder %s1175_s7, 9 }
  0x22   : > { %s1328_s10 = scalar_select %p193_p11, %s1143_s23, %s195_s17  }
  0x23   : > { %s1539_s29 = scalar_select %p1332_p13, 1, 0 }
  0x24   : > { %1538 = sst [smem:[#allocation21_spill]] %s1328_s10  ;;  %p262_p4 = pnand %p848_p0, %p261_p1 }
  0x25   : > { %1540 = sst [smem:[#allocation22_spill]] %s1539_s29  ;;  %s1507_s12 = sand.u32 (!%p262_p4), 1, %s1151_s25  }
  0x26   : > { %265 = sbr.rel (%p262_p4) target bundleno = 1416 (0x588), region = 40  ;;  %s1509_s13 = sand.u32 (!%p262_p4), 1, %s1139_s22  }
  0x27   : > { %s1342_s15 = sshll.u32 (!%p262_p4), %s1507_s12, 3  ;;  %s1346_s16 = sshll.u32 (!%p262_p4), %s1509_s13, 3 }
  0x28   : > { %p307_p2 = scmp.lt.s32.totalorder (!%p262_p4), %s1163_s28, 1  ;;  %p311_p5 = scmp.lt.s32.totalorder (!%p262_p4), %s1159_s27, 3 }
  0x29   : > { %s306_s8 = scalar_lea.vmem (!%p262_p4), [#allocation5], %s1346_s16  ;;  %p855_p6 = scmp.ne.s32.totalorder (!%p262_p4), %s1159_s27, 0 }
  0x2d   : > { %s308_s17 = scalar_select %p307_p2, %s1163_s28, 1 }
  0x2e   : > { %s1352_s19 = scalar_select %p311_p5, %s1159_s27, 3 }
  0x2f   : > { %s851_s20 = sshll.u32 %s308_s17, 3  ;;  %s299_s17 = scalar_lea.vmem [#allocation3], %s1342_s15  ;;  %vm327_vm0 = vcmask (!%p855_p6), 261120   ;;  %v1177_v0 = vmov (!%p855_p6), 0.0  }
  0x30   : > { %s310_s9 = scalar_lea.vmem %s1496_s0, %s851_s20  ;;  %s871_s12 = sshll.u32 %s1352_s19, 5  ;;  %328 = vst.msk [vmem:[#allocation2] sm:$0xff] (!%p855_p6), %vm327_vm0, %v1177_v0 }
  0x31   : > { %s315_s13 = scalar_lea.vmem %s1497_s1, %s871_s12  ;;  %s318_s21 = scalar_lea.vmem %s1498_s2, %s1352_s19 }
  0x32   : > { %s854_s18 = sshll.u32 %s1352_s19, 3  ;;  %326 = sbr.rel (%p855_p6) target bundleno = 57 (0x39), region = 44 }
  0x33   : > { %s1369_s6 = scalar_lea.vmem %s1499_s3, %s854_s18 }
  0x39 PF: > { %v330_v1 = vld [vmem:[%s315_s13] sm:$0xff]  ;;  %v331_v2 = vld [vmem:[%s315_s13 + $0x8] sm:$0xff]  ;;  %v332_v3 = vld [vmem:[%s315_s13 + $0x10] sm:$0xff]  ;;  %v1178_v4 = vmov 0.0|0.0   ;;  %vm1179_vm1 = vmmov 0   ;;  %v1180_v7 = vmov 0.0  }
  0x3a   : > { %909 = vmatprep.subr.bf16.mxu0 %v1178_v4  ;;  %v910_v5 = vpack.c.bf16 %v331_v2, %v330_v1  ;;  %v333_v6 = vld [vmem:[%s315_s13 + $0x18] sm:$0xff]  ;;  %891 = vmatprep.mubr.msk.f32.mxu0 %vm1179_vm1, %v1180_v7  ;;  %v329_v9 = vld [vmem:[%s310_s9] sm:$0xff]  ;;  %vm341_vm2 = vcmask 261120   ;;  %s1181_s26 = smov 120   ;;  %vm418_vm3 = vcmask 64512   ;;  %p862_p8 = scmp.ne.s32.totalorder %s1159_s27, 3 }
  0x3b   : > { %894 = vmatprep.subr.mxu1 %v1180_v7  ;;  %896 = vmatprep.mubr.msk.f32.mxu1 %vm1179_vm1, %v1180_v7  ;;  %v913_v8 = vpack.c.bf16 %v333_v6, %v332_v3  ;;  %v856_v10 = vld [vmem:[%s318_s21] ss:$0 sm:$0xff]  ;;  %s1182_s21 = smov 112  }
  0x3c   : > { %911 = vmatpush3.bf16.msra.mxu0 %v910_v5  ;;  %v583_v24 = vld [vmem:[%s1369_s6] sm:$0xff] }
  0x3d   : > { %912 = vmatprep.subr.bf16.mxu0 %v1178_v4  ;;  %v582_v31 = vld [vmem:[#allocation2] sm:$0xff] }
  0x3e   : > { %v863_v36 = vld [vmem:[%s1500_s4] ss:$0 sm:$0xff] (!%p862_p8) }
  0x40   : > { %914 = vmatpush3.bf16.msra.mxu0 %v913_v8 }
  0x41   : > { %904 = vmatprep.subr.mxu0 %v1180_v7 }
  0x43   : > { %892 = vmatmul.mubr.msk.f32.vlgmr.msra.gmra.mrb[0].mxu0 %vm341_vm2, %v329_v9 }
  0x44   : > { %906 = vmatprep.mubr.msk.f32.mxu0 %vm1179_vm1, %v1180_v7  ;;  %905 = vmatpush3.msra.mxu0 %v583_v24 }
 0x116   : > { %v411_v11 = vpop.f32.mrb[0].mxu0 }
 0x117   : > { %v412_v12 = vadd.f32 %v856_v10, %v411_v11  ;;  %v893_v13 = vpop.f32.mrb[1].mxu0 }
 0x119   : > { %416 = vrot.lane.b32.xlu0 %v412_v12, %s1181_s26 }
 0x18b   : > { %v417_v14 = vpop.permute.xlu0 %416 }
 0x18c   : > { %895 = vmatpush3.xpose.msk.msra.mxu1 %vm418_vm3, %v417_v14 }
 0x18d   : > { %899 = vmatprep.subr.mxu1 %v1180_v7 }
 0x18f   : > { %897 = vmatmul.mubr.msk.f32.vlgmr.msra.gmra.mrb[0].mxu1 %vm418_vm3, %v412_v12 }
 0x190   : > { %901 = vmatprep.mubr.msk.f32.mxu1 %vm1179_vm1, %v1180_v7 }
 0x262   : > { %v489_v15 = vpop.f32.mrb[0].mxu1 }
 0x263   : > { %v493_v16 = vmul.f32 0.35355338, %v489_v15  ;;  %v898_v17 = vpop.f32.mrb[1].mxu1 }
 0x265   : > { %v494_v18 = vsel %vm418_vm3, %v493_v16, -inf }
 0x266   : > { %495 = vmax.xlane.f32.xlu0 %v494_v18 }
 0x2f3   : > { %v496_v19 = vpop.xlane.xlu0 %495 }
 0x2f4   : > { %v497_v20 = vsub.f32 %v493_v16, %v496_v19 }
 0x2f6   : > { %v498_v21 = vmul.f32 1.442695, %v497_v20 }
 0x2f8   : > { %1021 = vpow2.f32 %v498_v21 }
 0x302   : > { %v1022_v22 = vpop.eup %1021 }
 0x303   : > { %v500_v23 = vsel %vm418_vm3, %v1022_v22, 0.0 }
 0x304   : > { %501 = vadd.xlane.f32.xlu1 %v500_v23 }
 0x315   : > { %506 = vrot.lane.b32.xlu1 %v412_v12, %s1182_s21 }
 0x391   : > { %v502_v25 = vpop.xlane.xlu1 %501 }
 0x392   : > { %1023 = vrcp.f32 %v502_v25 }
 0x395   : > { %v507_v26 = vpop.permute.xlu1 %506 }
 0x396   : > { %900 = vmatpush3.msra.mxu1 %v507_v26 }
 0x39c   : > { %v1024_v27 = vpop.eup %1023 }
 0x39d   : > { %v504_v28 = vmul.f32 %v1024_v27, %v1022_v22 }
 0x39f   : > { %505 = vst.msk [vmem:[%s306_s8] sm:$0xff] %vm418_vm3, %v504_v28  ;;  %902 = vmatmul.mubr.msk.f32.vlgmr.msra.gmra.mrb[2].mxu1 %vm418_vm3, %v504_v28 }
 0x472   : > { %v578_v29 = vpop.f32.mrb[2].mxu1 }
 0x473   : > { %v903_v30 = vpop.f32.mrb[3].mxu1  ;;  %907 = vmatmul.mubr.msk.f32.vlgmr.msra.gmra.mrb[2].mxu0 %vm418_vm3, %v578_v29 }
 0x543   : > { %662 = sbr.rel (%p862_p8) target bundleno = 1364 (0x554), region = 48 }
 0x546   : > { %v653_v32 = vpop.f32.mrb[2].mxu0 }
 0x547   : > { %v657_v33 = vadd.f32 %v653_v32, %v582_v31  ;;  %v908_v34 = vpop.f32.mrb[3].mxu0 }
 0x549   : > { %658 = vst.msk [vmem:[#allocation2] sm:$0xff] %vm341_vm2, %v657_v33 }
 0x550   : > { %v663_v35 = vld [vmem:[#allocation2] sm:$0xff] }
 0x551   : > { %v671_v37 = vadd.f32 %v863_v36, %v663_v35 }
 0x553   : > { %672 = vst.msk [vmem:[%s299_s17] sm:$0xff] %vm341_vm2, %v671_v37 }
 0x554 PF: > { %s866_s30 = sshll.u32 %s1163_s28, 7  ;;  %s692_s18 = sshll.u32 %s299_s17, 4  ;;  %s693_s18 = int_to_ptr.vmem [resolvable:$true] %s692_s18 }
 0x555   : > { %s1406_s11 = scalar_lea.hbm %s1501_s5, %s866_s30  ;;  %s1541_s9 = sand.u32 1, %s1151_s25  }
 0x556   : > { %s674_s12 = scalar_lea.sflag [#allocation4], %s1541_s9  ;;  %s1025_s13 = scalar_lea.vmem %s693_s18, 128 }
 0x557   : > { %p1026_p9 = scmp.ne.s32.totalorder %s693_s18, %s1025_s13  ;;  %s1183_s19 = smov [#allocation3]  }
 0x558   : > { %s1029_s20 = sshll.u32 %s1183_s19, 4  ;;  %s1030_s20 = int_to_ptr.vmem [resolvable:$false] %s1029_s20 }
 0x559   : > { %p1027_p10 = pnand %p1026_p9, %p1291_p3  ;;  %s1031_s23 = scalar_lea.vmem %s1030_s20, 256 }
 0x55a   : > { %p1032_p0 = scmp.lt.s32.totalorder %s693_s18, %s1030_s20  ;;  %p1033_p1 = scmp.lt.s32.totalorder %s1031_s23, %s1025_s13 }
 0x55b   : > { %p1028_p11 = pneg %p1027_p10 }
 0x55c   : > { %p1034_p4 = por %p1033_p1, %p1032_p0 }
 0x55e   : > { %p1035_p2 = pnand %p1034_p4, %p1028_p11 }
 0x560   : > { %1038 = shalt.err (!%p1035_p2)
}
 0x561   : > { %s1039_s15 = scalar_lea.hbm %s1406_s11, 128  ;;  %s1043_s26 = scalar_lea.hbm %s1501_s5, 256 }
 0x562   : > { %p1040_p5 = scmp.ne.s32.totalorder %s1406_s11, %s1039_s15  ;;  %p1044_p9 = scmp.lt.u32.totalorder %s1406_s11, %s1501_s5 }
 0x563   : > { %p1045_p10 = scmp.lt.u32.totalorder %s1043_s26, %s1039_s15  ;;  %p1047_p0 = scmp.lt.u32.totalorder %s1039_s15, %s1406_s11 }
 0x564   : > { %p1041_p6 = pnand %p1040_p5, %p1291_p3 }
 0x565   : > { %p1046_p11 = por %p1045_p10, %p1044_p9 }
 0x566   : > { %p1042_p8 = pneg %p1041_p6 }
 0x567   : > { %p1048_p1 = por %p1047_p0, %p1046_p11 }
 0x569   : > { %p1049_p4 = pnand %p1048_p1, %p1042_p8 }
 0x56b   : > { %1052 = shalt.err (!%p1049_p4)
}
 0x56c   : > { %915 = dma.vmem_to_hbm [thread:$0]  (%p1291_p3), %s693_s18, 128, %s1406_s11, %s674_s12  }
 0x56d   : > { %s867_s30 = sshll.u32 %s1163_s28, 2  ;;  %s707_s7 = sshll.u32 %s306_s8, 4  ;;  %s1433_s7 = int_to_ptr.vmem [resolvable:$true] %s707_s7 }
 0x56e   : > { %s703_s10 = sadd.s32 %s1159_s27, %s867_s30  ;;  %s1543_s14 = sld [smem:[#allocation23_spill]] }
 0x56f   : > { %s868_s9 = sshll.u32 %s703_s10, 7  ;;  %s1544_s23 = sand.u32 1, %s1139_s22  }
 0x570   : > { %s679_s15 = scalar_lea.sflag [#allocation6], %s1544_s23  ;;  %s1053_s17 = scalar_lea.vmem %s1433_s7, 128 }
 0x571   : > { %p1054_p2 = scmp.ne.s32.totalorder %s1433_s7, %s1053_s17  ;;  %s1184_s28 = smov [#allocation5]  }
 0x572   : > { %s1057_s8 = sshll.u32 %s1184_s28, 4  ;;  %s1058_s8 = int_to_ptr.vmem [resolvable:$false] %s1057_s8 }
 0x573   : > { %p1055_p3 = pnand %p1054_p2, %p1320_p12  ;;  %s1059_s27 = scalar_lea.vmem %s1058_s8, 256 }
 0x574   : > { %s705_s20 = scalar_lea.hbm %s1543_s14, %s868_s9  ;;  %p1060_p6 = scmp.lt.s32.totalorder %s1433_s7, %s1058_s8 }
 0x575   : > { %p1056_p5 = pneg %p1055_p3  ;;  %p1061_p8 = scmp.lt.s32.totalorder %s1059_s27, %s1053_s17 }
 0x577   : > { %p1062_p9 = por %p1061_p8, %p1060_p6 }
 0x579   : > { %p1063_p10 = pnand %p1062_p9, %p1056_p5 }
 0x57b   : > { %1066 = shalt.err (!%p1063_p10)
}
 0x57c   : > { %s1067_s16 = scalar_lea.hbm %s705_s20, 128  ;;  %s1071_s12 = scalar_lea.hbm %s1543_s14, 1024 }
 0x57d   : > { %p1068_p11 = scmp.ne.s32.totalorder %s705_s20, %s1067_s16  ;;  %p1072_p4 = scmp.lt.u32.totalorder %s705_s20, %s1543_s14 }
 0x57e   : > { %p1073_p2 = scmp.lt.u32.totalorder %s1071_s12, %s1067_s16  ;;  %p1075_p13 = scmp.lt.u32.totalorder %s1067_s16, %s705_s20 }
 0x57f   : > { %p1069_p0 = pnand %p1068_p11, %p1320_p12 }
 0x580   : > { %p1074_p3 = por %p1073_p2, %p1072_p4 }
 0x581   : > { %p1070_p1 = pneg %p1069_p0 }
 0x582   : > { %p1076_p6 = por %p1075_p13, %p1074_p3 }
 0x584   : > { %p1077_p5 = pnand %p1076_p6, %p1070_p1 }
 0x586   : > { %1080 = shalt.err (!%p1077_p5)
}
 0x587   : > { %916 = dma.vmem_to_hbm [thread:$0]  (%p1320_p12), %s1433_s7, 128, %s705_s20, %s679_s15  }
 0x588 PF: > { %s1545_s21 = sld [smem:[#allocation15_spill]]  ;;  %s1546_s6 = sld [smem:[#allocation11_spill]] }
 0x58e   : > { %p926_p8 = scmp.ge.s32.totalorder %s1545_s21, 2  ;;  %s719_s10 = sand.u32 1, %s1546_s6  }
 0x58f   : > { %s720_s9 = scalar_lea.sflag [#allocation4], %s719_s10 }
 0x590   : > { %p920_p9 = pnand %p926_p8, %p1308_p7 }
 0x592   : > { %1126 = dma.done.wait (!%p920_p9), %s720_s9, 128  }
 0x593   : > { %1128 = vsyncadd (!%p920_p9), %s720_s9, 4294967168  ;;  %s1548_s13 = sld [smem:[#allocation9_spill]]  ;;  %s1549_s19 = sld [smem:[#allocation22_spill]] }
 0x599   : > { %s728_s23 = sand.u32 1, %s1548_s13   ;;  %p1550_p13 = scmp.ne.s32.totalorder %s1549_s19, 0 }
 0x59a   : > { %s729_s17 = scalar_lea.sflag [#allocation6], %s728_s23 }
 0x59b   : > { %p923_p10 = pnand %p926_p8, %p1550_p13 }
 0x59d   : > { %1130 = dma.done.wait (!%p923_p10), %s729_s17, 128  }
 0x59e   : > { %1132 = vsyncadd (!%p923_p10), %s729_s17, 4294967168  ;;  %s23_s7 = sadd.s32 1, %s1545_s21   ;;  %s1551_s29 = sld [smem:[#allocation10_spill]] }
 0x59f   : > { %p20_p12 = scmp.ge.s32.totalorder %s23_s7, 10   ;;  %s1552_s23 = sld [smem:[#allocation21_spill]] }
 0x5a0   : > { %s1553_s20 = sld [smem:[#allocation12_spill]]  ;;  %s1554_s26 = sld [smem:[#allocation20_spill]] }
 0x5a1   : > { %s1555_s27 = sld [smem:[#allocation13_spill]]  ;;  %s1556_s28 = sld [smem:[#allocation14_spill]] }
 0x5a2   : > { %s1557_s15 = sld [smem:[#allocation16_spill]]  ;;  %s1558_s30 = sld [smem:[#allocation17_spill]] }
 0x5a3   : > { %s1559_s21 = smov %s1139_s22  ;;  %s1561_s24 = smov %s1151_s25 }
 0x5a4   : > { %s1560_s22 = smov %s1551_s29  ;;  %22 = sbr.rel (!%p20_p12) target bundleno = 11 (0xb), region = 109 }
 0x5a6   : > { %s1562_s25 = smov %s1553_s20 }
 0x5a8   : > { %s1563_s29 = smov %s1557_s15 }
 0x5ab   :  { %734 = vsyncpa [#allocation4], 1 }
 0x5ac   :  { %736 = vsyncpa [#allocation4 + $0x1], 1 }
 0x5ad   :  { %737 = vsyncpa [#allocation6], 1 }
 0x5ae   :  { %739 = vsyncpa [#allocation6 + $0x1], 1 }

</bundles_post_ra>
